<compile_context>
chip_gen: v5e
topology: v5e:2x2
jax: 0.10.0
libtpu: 0.0.40
codegen_flags: <defaults>
</compile_context>

<pallas_src>
import functools

import jax
import jax.numpy as jnp
from jax.experimental import pallas as pl
from jax.experimental.pallas import tpu as pltpu


def _round_up(x: int, m: int) -> int:
    return ((x + m - 1) // m) * m


def fc_kernel(x_ref, w_ref, b_ref, o_ref):
    # x_ref: [TM, F_pad]   w_ref: [F_pad, C_pad]   b_ref: [1, C_pad] (f32)
    # o_ref: [TM, C_pad]
    acc = jnp.dot(x_ref[...], w_ref[...], preferred_element_type=jnp.float32)
    o_ref[...] = (acc + b_ref[...]).astype(o_ref.dtype)


@functools.partial(jax.jit, static_argnames=("tm", "compute_dtype"))
def fc_prediction(x: jax.Array, weight: jax.Array, bias: jax.Array,
                  *, tm: int = 512, compute_dtype=None) -> jax.Array:
    """Pallas equivalent of FCPrediction.forward.

    Args:
      x:      [B, T, F] float32
      weight: [C, F]    float32 (PyTorch nn.Linear layout)
      bias:   [C]       float32
      tm:     row-tile size along M = B*T.
      compute_dtype: optional streamed-operand dtype (e.g. jnp.bfloat16).
    Returns:
      logits: [B, T, C] in x.dtype.
    """
    B, T, F = x.shape
    C = weight.shape[0]
    M = B * T

    out_dtype = x.dtype
    compute_dtype = jnp.dtype(compute_dtype) if compute_dtype is not None else jnp.dtype(out_dtype)

    # Sublane granularity depends on element width (f32 -> 8, bf16 -> 16).
    sub = 16 if compute_dtype.itemsize == 2 else 8

    # Lane-dense output: pad classes up to a multiple of 128.
    C_pad = _round_up(C, 128)
    # Sublane-align the contraction dim only (keeps x HBM traffic minimal).
    F_pad = _round_up(F, sub)
    # Row tile: cap at `tm`, never larger than needed for small M.
    TM = min(_round_up(tm, sub), _round_up(M, sub))
    M_pad = _round_up(M, TM)

    # --- Operand preparation (constant-folds under jit for static weights) ---
    x2 = x.reshape(M, F).astype(compute_dtype)
    if (M_pad != M) or (F_pad != F):
        x2 = jnp.pad(x2, ((0, M_pad - M), (0, F_pad - F)))
    # W stored [F_pad, C_pad]; padded rows/cols are exact zeros so padded
    # output columns are exactly bias-free zeros + 0 and get sliced off.
    w = jnp.zeros((F_pad, C_pad), compute_dtype).at[:F, :C].set(
        weight.T.astype(compute_dtype))
    # Bias kept in f32 so the add happens on the f32 accumulator.
    b = jnp.zeros((1, C_pad), jnp.float32).at[0, :C].set(bias.astype(jnp.float32))

    grid = (M_pad // TM,)

    # Explicit VMEM budget: double-buffered x + double-buffered output
    # + resident W + bias, with headroom.  Capped at 64 MiB so it is valid
    # on v7x; >= 32 MiB so we never shrink below comfortable scoped defaults.
    cd_bytes = compute_dtype.itemsize
    od_bytes = jnp.dtype(out_dtype).itemsize
    est = (2 * TM * F_pad * cd_bytes          # x double buffer
           + 2 * TM * C_pad * od_bytes        # out double buffer
           + F_pad * C_pad * cd_bytes         # resident W
           + C_pad * 4)                       # resident bias
    vmem_limit = min(max(2 * est, 32 << 20), 64 << 20)

    vmem = pltpu.MemorySpace.VMEM
    out = pl.pallas_call(
        fc_kernel,
        out_shape=jax.ShapeDtypeStruct((M_pad, C_pad), out_dtype),
        grid=grid,
        in_specs=[
            pl.BlockSpec((TM, F_pad), lambda i: (i, 0), memory_space=vmem),
            pl.BlockSpec((F_pad, C_pad), lambda i: (0, 0), memory_space=vmem),
            pl.BlockSpec((1, C_pad), lambda i: (0, 0), memory_space=vmem),
        ],
        out_specs=pl.BlockSpec((TM, C_pad), lambda i: (i, 0), memory_space=vmem),
        compiler_params=pltpu.CompilerParams(
            dimension_semantics=("parallel",),   # shards row tiles on v7x's 2 TCs
            vmem_limit_bytes=vmem_limit,
        ),
    )(x2, w, b)

    # Drop padded rows/classes, restore [B, T, C].
    return out[:M, :C].reshape(B, T, C)


if __name__ == "__main__":
    # Small shapes consistent with the module's forward:
    #   input [Batch, Temporal, Feature] -> output [Batch, Temporal, Classes]
    # NOTE: at this demo size the call is launch-overhead bound; the tiling
    # pays off once B*T reaches the thousands.
    B, T, F, C = 2, 8, 32, 10

    key = jax.random.PRNGKey(0)
    kx, kw, kb = jax.random.split(key, 3)

    x = jax.random.normal(kx, (B, T, F), dtype=jnp.float32)

    # Deterministic nn.Linear-style init: U(-1/sqrt(F), 1/sqrt(F))
    bound = 1.0 / jnp.sqrt(jnp.float32(F))
    weight = jax.random.uniform(kw, (C, F), minval=-bound, maxval=bound,
                                dtype=jnp.float32)
    bias = jax.random.uniform(kb, (C,), minval=-bound, maxval=bound,
                              dtype=jnp.float32)

    logits = fc_prediction(x, weight, bias)
    logits = jax.block_until_ready(logits)

    # Correctness check against a plain-JAX reference of the PyTorch forward.
    ref = (x.reshape(B * T, F) @ weight.T + bias).reshape(B, T, C)
    assert logits.shape == (B, T, C)
    assert jnp.allclose(logits, ref, atol=1e-5, rtol=1e-5)

    print("KERNEL_OK")
</pallas_src>

<mosaic_0001>
module attributes {stable_mosaic.version = 11 : i64} {
  func.func @fc_kernel(%arg0: i32, %arg1: memref<16x32xf32, #tpu.memory_space<vmem>>, %arg2: memref<32x128xf32, #tpu.memory_space<vmem>>, %arg3: memref<1x128xf32, #tpu.memory_space<vmem>>, %arg4: memref<16x128xf32, #tpu.memory_space<vmem>>) attributes {dimension_semantics = [#tpu.dimension_semantics<parallel>], iteration_bounds = array<i64: 1>, scalar_prefetch = 0 : i64, scratch_operands = 0 : i64, tpu.core_type = #tpu.core_type<tc>, window_params = [{transform_indices = @transform_0, window_bounds = array<i64: 16, 32>}, {pipeline_mode = #tpu.pipeline_mode<synchronous>, transform_indices = @transform_1, window_bounds = array<i64: 32, 128>}, {pipeline_mode = #tpu.pipeline_mode<synchronous>, transform_indices = @transform_2, window_bounds = array<i64: 1, 128>}, {transform_indices = @transform_3, window_bounds = array<i64: 16, 128>}]} {
    %c0 = arith.constant 0 : index
    %c0_0 = arith.constant 0 : index
    %0 = vector.load %arg1[%c0, %c0_0] : memref<16x32xf32, #tpu.memory_space<vmem>>, vector<16x32xf32>
    %c0_1 = arith.constant 0 : index
    %c0_2 = arith.constant 0 : index
    %1 = vector.load %arg2[%c0_1, %c0_2] : memref<32x128xf32, #tpu.memory_space<vmem>>, vector<32x128xf32>
    %cst = arith.constant dense<0.000000e+00> : vector<16x128xf32>
    %2 = tpu.matmul %0, %1, %cst {dimension_numbers = #tpu.dot_dimension_numbers<[1], [0], [0], [1], [0, 0, 1, 1], [], []>} : vector<16x32xf32>, vector<32x128xf32>, vector<16x128xf32> -> vector<16x128xf32>
    %c0_3 = arith.constant 0 : index
    %c0_4 = arith.constant 0 : index
    %3 = vector.load %arg3[%c0_3, %c0_4] : memref<1x128xf32, #tpu.memory_space<vmem>>, vector<1x128xf32>
    %4 = vector.broadcast %3 : vector<1x128xf32> to vector<16x128xf32>
    %5 = arith.addf %2, %4 : vector<16x128xf32>
    %c0_5 = arith.constant 0 : index
    %c0_6 = arith.constant 0 : index
    %6 = vector.load %arg4[%c0_5, %c0_6] : memref<16x128xf32, #tpu.memory_space<vmem>>, vector<16x128xf32>
    tpu.vector_store %arg4[%c0_5, %c0_6], %5 {strides = array<i32>} : memref<16x128xf32, #tpu.memory_space<vmem>>, vector<16x128xf32>,
    return
  }
  func.func @transform_0(%arg0: i32) -> (i32, i32) {
    %c0_i32 = arith.constant 0 : i32
    %c0_i32_0 = arith.constant 0 : i32
    return %arg0, %c0_i32 : i32, i32
  }
  func.func @transform_1(%arg0: i32) -> (i32, i32) {
    %c0_i32 = arith.constant 0 : i32
    %c0_i32_0 = arith.constant 0 : i32
    %c0_i32_1 = arith.constant 0 : i32
    return %c0_i32, %c0_i32_0 : i32, i32
  }
  func.func @transform_2(%arg0: i32) -> (i32, i32) {
    %c0_i32 = arith.constant 0 : i32
    %c0_i32_0 = arith.constant 0 : i32
    %c0_i32_1 = arith.constant 0 : i32
    return %c0_i32, %c0_i32_0 : i32, i32
  }
  func.func @transform_3(%arg0: i32) -> (i32, i32) {
    %c0_i32 = arith.constant 0 : i32
    %c0_i32_0 = arith.constant 0 : i32
    return %arg0, %c0_i32 : i32, i32
  }
}

</mosaic_0001>

<bundles_post_ra>
// kernel: fc_prediction.1
= control target key start
LH: loop header
LB: loop body
LE: loop exit
PB: predicated region body
PF: predicated region fallthrough
CT: control target
= control target key end

     0   :  { %vm24_vm0 = vcmask 261120   ;;  %s114_s1 = inlined_call_operand.vmem [shape: f32[32,128], index: 1, kind: input, shape index: {}]   ;;  %s115_s2 = inlined_call_operand.vmem [shape: f32[1,128], index: 2, kind: input, shape index: {}]   ;;  %s116_s0 = inlined_call_operand.vmem [shape: f32[16,32], index: 0, kind: input, shape index: {}]   ;;  %s117_s3 = inlined_call_operand.vmem [shape: f32[16,128], index: 3, kind: output, shape index: {}]  }
   0x1   :  { %v19_v0 = vld [vmem:[%s114_s1 + $0x18] sm:$0xff]  ;;  %v18_v1 = vld [vmem:[%s114_s1 + $0x10] sm:$0xff]  ;;  %v17_v2 = vld [vmem:[%s114_s1 + $0x8] sm:$0xff] }
   0x2   :  { %43 = vmatpush.msra.mxu0 %v19_v0  ;;  %62 = vmatpush.msra.mxu1 %v19_v0  ;;  %v16_v3 = vld [vmem:[%s114_s1] sm:$0xff]  ;;  %v15_v5 = vld [vmem:[%s116_s0 + $0x8] sm:$0xff] }
   0x3   :  { %v14_v4 = vld [vmem:[%s116_s0] sm:$0xff] }
   0x4   :  { %44 = vmatpush.msra.mxu0 %v18_v1  ;;  %63 = vmatpush.msra.mxu1 %v18_v1  ;;  %v66_v6 = vld [vmem:[%s115_s2] ss:$0 sm:$0xff] }
   0x6   :  { %45 = vmatpush.msra.mxu0 %v17_v2  ;;  %64 = vmatpush.msra.mxu1 %v17_v2 }
   0x8   :  { %46 = vmatpush.msra.mxu0 %v16_v3  ;;  %65 = vmatpush.msra.mxu1 %v16_v3 }
   0x9   :  { %60 = vmatmul.msk.f32.vlgmr.msra.gmra.mxu0 %vm24_vm0, %v14_v4  ;;  %61 = vmatmul.msk.f32.vlgmr.msra.gmra.mxu1 %vm24_vm0, %v15_v5 }
  0x86   :  { %v48_v7 = vpop.f32.mrf.mxu0  ;;  %v51_v8 = vpop.f32.mrf.mxu1 }
  0x87   :  { %v49_v9 = vadd.f32 %v66_v6, %v48_v7  ;;  %v52_v10 = vadd.f32 %v66_v6, %v51_v8 }
  0x89   :  { %54 = vst [vmem:[%s117_s3] sm:$0xff] %v49_v9 }
  0x8a   :  { %55 = vst [vmem:[%s117_s3 + $0x8] sm:$0xff] %v52_v10 }

</bundles_post_ra>
